<compile_context>
chip_gen: v5e
topology: v5e:2x2
jax: 0.10.0
libtpu: 0.0.40
codegen_flags: <defaults>
</compile_context>

<pallas_src>
import functools

import jax
import jax.numpy as jnp
from jax import lax
from jax.experimental import pallas as pl
from jax.experimental.pallas import tpu as pltpu


def _focal_loss_kernel(logits_ref, target_ref, out_ref, *, alpha, gamma,
                       reduction, n_total):
    x = logits_ref[...].astype(jnp.float32)      # (tile_n, C), upcast in VMEM
    t = target_ref[...]                           # (tile_n, 1) int32
    tn, c = x.shape

    # Row validity: the last grid block may overrun the true batch size
    # (inputs are NOT padded), so mask rows past n_total; also mask
    # out-of-range / negative targets (they contribute exactly zero loss).
    row_ids = pl.program_id(0) * tn + lax.broadcasted_iota(jnp.int32, (tn, 1), 0)
    valid = (row_ids < n_total) & (t >= 0) & (t < c)

    # Numerically stable log-sum-exp over the class axis.
    m = jnp.max(x, axis=-1, keepdims=True)                               # (tn, 1)
    lse = m + jnp.log(jnp.sum(jnp.exp(x - m), axis=-1, keepdims=True))   # (tn, 1)

    # Select-based gather of the target logit: no f32 one-hot, no logp temp.
    # Garbage tail rows can carry NaN/inf, but they are confined to their own
    # row and discarded by the where(valid, ...) below (forward-safe select).
    class_ids = lax.broadcasted_iota(jnp.int32, (tn, c), 1)
    x_t = jnp.sum(jnp.where(class_ids == t, x, 0.0), axis=-1, keepdims=True)
    logpt = jnp.where(valid, x_t - lse, 0.0)                             # (tn, 1)

    pt = jnp.exp(logpt)
    one_minus_pt = jnp.maximum(1.0 - pt, 0.0)    # guard exp() rounding pt > 1
    if float(gamma) == int(gamma):
        focal = lax.integer_pow(one_minus_pt, int(gamma))  # VPU mults, no EUP pow
    else:
        focal = one_minus_pt ** gamma
    loss = jnp.where(valid, -alpha * focal * logpt, 0.0)   # (tn, 1)

    if reduction == "none":
        out_ref[...] = loss
    else:
        # Per-tile partial sum on the scalar path (SMEM); the global mean/sum
        # is finished in the wrapper with the true batch size.
        out_ref[0, 0] = jnp.sum(loss)


def _pick_tile_n(n, c, itemsize):
    """Rows per tile.

    Targets a ~2 MiB HBM-side logits block (double-buffered by Pallas) using
    the lane-padded footprint tile_n * max(C, 128) * itemsize, capped so that
    the grid keeps >= 4 tiles when N allows it (v7x dual-TC / megacore).
    """
    granule = 16 if itemsize == 2 else 8       # sublane packing for 16-bit dtypes
    lanes = max(c, 128)                        # VMEM/vreg tiles are 128-lane padded
    budget_per_buffer = 2 * 1024 * 1024        # ~2 MiB/block, x2 for double-buffering
    max_rows = max(granule, budget_per_buffer // (lanes * itemsize))

    # Keep at least ~4 grid tiles when the batch is big enough.
    quarter = -(-n // 4)
    quarter = -(-quarter // granule) * granule
    tile = min(max_rows, 8192, max(quarter, granule))

    if tile >= n:
        return n                               # single block == full batch dim (always legal)
    return max(granule, (tile // granule) * granule)


def focal_loss(logits, targets, *, alpha=1.0, gamma=2.0, reduction="mean", tile_n=None):
    """Pallas TPU focal loss.  logits: (N, C) float (any dtype), targets: (N,) int.

    Matches the PyTorch FocalLoss forward.  Note: out-of-range / negative
    targets contribute exactly zero loss (but are still counted in the 'mean'
    denominator) instead of erroring like PyTorch — documented divergence.
    """
    n, c = logits.shape
    itemsize = jnp.dtype(logits.dtype).itemsize
    if tile_n is None:
        tile_n = _pick_tile_n(n, c, itemsize)
    tile_n = min(tile_n, n)

    num_tiles = (n + tile_n - 1) // tile_n
    targets2d = targets.astype(jnp.int32).reshape(n, 1)   # tiny; logits are NOT padded

    kernel = functools.partial(
        _focal_loss_kernel,
        alpha=float(alpha),
        gamma=float(gamma),
        reduction=reduction,
        n_total=n,
    )

    in_specs = [
        # Class axis unblocked (full C); native dtype streams straight from HBM.
        pl.BlockSpec((tile_n, c), lambda i: (i, 0)),
        pl.BlockSpec((tile_n, 1), lambda i: (i, 0)),
    ]

    if reduction in ("mean", "sum"):
        out_shape = jax.ShapeDtypeStruct((num_tiles, 1), jnp.float32)
        out_specs = pl.BlockSpec((1, 1), lambda i: (i, 0),
                                 memory_space=pltpu.MemorySpace.SMEM)
    else:  # 'none'
        out_shape = jax.ShapeDtypeStruct((n, 1), jnp.float32)
        out_specs = pl.BlockSpec((tile_n, 1), lambda i: (i, 0))

    out = pl.pallas_call(
        kernel,
        grid=(num_tiles,),
        in_specs=in_specs,
        out_specs=out_specs,
        out_shape=out_shape,
        compiler_params=pltpu.CompilerParams(
            # Tiles are independent -> megacore / v7x dual-TC friendly.
            dimension_semantics=("parallel",),
            # Conservative explicit budget; tile sizing above keeps the
            # lane-padded footprint well inside this on every generation.
            vmem_limit_bytes=32 * 1024 * 1024,
        ),
    )(logits, targets2d)

    if reduction == "mean":
        return jnp.sum(out) / jnp.float32(n)     # divide by the TRUE batch size
    if reduction == "sum":
        return jnp.sum(out)
    return out[:, 0]


def _focal_loss_ref(logits, targets, alpha=1.0, gamma=2.0, reduction="mean"):
    """Pure-JAX reference matching torch semantics."""
    logp = jax.nn.log_softmax(logits.astype(jnp.float32), axis=-1)
    logpt = jnp.take_along_axis(logp, targets[:, None].astype(jnp.int32), axis=-1)[:, 0]
    pt = jnp.exp(logpt)
    loss = -alpha * (1.0 - pt) ** gamma * logpt
    if reduction == "mean":
        return loss.mean()
    if reduction == "sum":
        return loss.sum()
    return loss


if __name__ == "__main__":
    key = jax.random.PRNGKey(0)
    k1, k2, k3, k4, k5, k6 = jax.random.split(key, 6)

    # Primary small shape: batch=8, classes=16, f32, reduction='mean'.
    N, C = 8, 16
    logits = jax.random.normal(k1, (N, C), dtype=jnp.float32)
    targets = jax.random.randint(k2, (N,), 0, C, dtype=jnp.int32)

    out = focal_loss(logits, targets, alpha=1.0, gamma=2.0, reduction="mean")
    out = jax.block_until_ready(out)
    ref = _focal_loss_ref(logits, targets, 1.0, 2.0, "mean")
    assert jnp.allclose(out, ref, rtol=1e-5, atol=1e-4), (out, ref)

    # Native-dtype pass-through: bf16 logits stream straight into the kernel
    # (upcast happens in VMEM), no wrapper-side f32 copy through HBM.
    logits_bf16 = logits.astype(jnp.bfloat16)
    out_bf16 = jax.block_until_ready(focal_loss(logits_bf16, targets, reduction="mean"))
    ref_bf16 = _focal_loss_ref(logits_bf16, targets, 1.0, 2.0, "mean")
    assert jnp.allclose(out_bf16, ref_bf16, rtol=1e-5, atol=1e-4), (out_bf16, ref_bf16)

    # Multi-tile grid with an UNPADDED partial tail block, all reductions.
    N2, C2 = 200, 32
    logits2 = jax.random.normal(k3, (N2, C2), dtype=jnp.float32)
    targets2 = jax.random.randint(k4, (N2,), 0, C2, dtype=jnp.int32)
    for red in ("mean", "sum", "none"):
        got = jax.block_until_ready(focal_loss(logits2, targets2, reduction=red, tile_n=64))
        want = _focal_loss_ref(logits2, targets2, 1.0, 2.0, red)
        assert jnp.allclose(got, want, rtol=1e-5, atol=1e-4), (red, got, want)

    # Larger batch: exercises the auto tile picker (>= 4 tiles, ~2 MiB blocks)
    # and the no-pad boundary-block masking in both reduction modes.
    N3, C3 = 5000, 16
    logits3 = jax.random.normal(k5, (N3, C3), dtype=jnp.float32)
    targets3 = jax.random.randint(k6, (N3,), 0, C3, dtype=jnp.int32)
    for red in ("mean", "none"):
        got = jax.block_until_ready(focal_loss(logits3, targets3, reduction=red))
        want = _focal_loss_ref(logits3, targets3, 1.0, 2.0, red)
        assert jnp.allclose(got, want, rtol=1e-5, atol=1e-4), (red,)

    print("KERNEL_OK")
</pallas_src>

<mosaic_0001>
module attributes {stable_mosaic.version = 11 : i64} {
  func.func @_focal_loss_kernel(%arg0: i32, %arg1: memref<8x16xf32, #tpu.memory_space<vmem>>, %arg2: memref<8x1xi32, #tpu.memory_space<vmem>>, %arg3: memref<1x1xf32, #tpu.memory_space<smem>>) attributes {dimension_semantics = [#tpu.dimension_semantics<parallel>], iteration_bounds = array<i64: 1>, scalar_prefetch = 0 : i64, scratch_operands = 0 : i64, tpu.core_type = #tpu.core_type<tc>, window_params = [{transform_indices = @transform_0, window_bounds = array<i64: 8, 16>}, {transform_indices = @transform_1, window_bounds = array<i64: 8, 1>}, {transform_indices = @transform_2, window_bounds = array<i64: 1, 1>}]} {
    %c0 = arith.constant 0 : index
    %c0_0 = arith.constant 0 : index
    %0 = vector.load %arg1[%c0, %c0_0] : memref<8x16xf32, #tpu.memory_space<vmem>>, vector<8x16xf32>
    %c0_1 = arith.constant 0 : index
    %c0_2 = arith.constant 0 : index
    %1 = vector.load %arg2[%c0_1, %c0_2] : memref<8x1xi32, #tpu.memory_space<vmem>>, vector<8x1xi32>
    %c8_i32 = arith.constant 8 : i32
    %2 = arith.muli %arg0, %c8_i32 : i32
    %3 = tpu.iota {dimensions = array<i32: 0>} : vector<8x1xi32>
    %4 = vector.broadcast %2 : i32 to vector<8x1xi32>
    %5 = arith.addi %4, %3 : vector<8x1xi32>
    %c8_i32_3 = arith.constant 8 : i32
    %6 = vector.broadcast %c8_i32_3 : i32 to vector<8x1xi32>
    %7 = arith.cmpi slt, %5, %6 : vector<8x1xi32>
    %c0_i32 = arith.constant 0 : i32
    %8 = vector.broadcast %c0_i32 : i32 to vector<8x1xi32>
    %9 = arith.cmpi sge, %1, %8 : vector<8x1xi32>
    %10 = arith.andi %7, %9 : vector<8x1xi1>
    %c16_i32 = arith.constant 16 : i32
    %11 = vector.broadcast %c16_i32 : i32 to vector<8x1xi32>
    %12 = arith.cmpi slt, %1, %11 : vector<8x1xi32>
    %13 = arith.andi %10, %12 : vector<8x1xi1>
    %cst = arith.constant dense<0xFF800000> : vector<8xf32>
    %14 = vector.multi_reduction <maximumf>, %0, %cst [1] : vector<8x16xf32> to vector<8xf32>
    %15 = vector.shape_cast %14 : vector<8xf32> to vector<8x1xf32>
    %16 = vector.broadcast %15 : vector<8x1xf32> to vector<8x16xf32>
    %17 = arith.subf %0, %16 : vector<8x16xf32>
    %18 = math.exp %17 : vector<8x16xf32>
    %cst_4 = arith.constant dense<0.000000e+00> : vector<8xf32>
    %19 = vector.multi_reduction <add>, %18, %cst_4 [1] : vector<8x16xf32> to vector<8xf32>
    %20 = vector.shape_cast %19 : vector<8xf32> to vector<8x1xf32>
    %21 = math.log %20 : vector<8x1xf32>
    %22 = arith.addf %15, %21 : vector<8x1xf32>
    %23 = tpu.iota {dimensions = array<i32: 1>} : vector<8x16xi32>
    %24 = vector.broadcast %1 : vector<8x1xi32> to vector<8x16xi32>
    %25 = arith.cmpi eq, %23, %24 : vector<8x16xi32>
    %cst_5 = arith.constant 0.000000e+00 : f32
    %26 = vector.broadcast %cst_5 : f32 to vector<8x16xf32>
    %27 = arith.select %25, %0, %26 : vector<8x16xi1>, vector<8x16xf32>
    %cst_6 = arith.constant dense<0.000000e+00> : vector<8xf32>
    %28 = vector.multi_reduction <add>, %27, %cst_6 [1] : vector<8x16xf32> to vector<8xf32>
    %29 = vector.shape_cast %28 : vector<8xf32> to vector<8x1xf32>
    %30 = arith.subf %29, %22 : vector<8x1xf32>
    %cst_7 = arith.constant 0.000000e+00 : f32
    %31 = vector.broadcast %cst_7 : f32 to vector<8x1xf32>
    %32 = arith.select %13, %30, %31 : vector<8x1xi1>, vector<8x1xf32>
    %33 = math.exp %32 : vector<8x1xf32>
    %cst_8 = arith.constant 1.000000e+00 : f32
    %34 = vector.broadcast %cst_8 : f32 to vector<8x1xf32>
    %35 = arith.subf %34, %33 : vector<8x1xf32>
    %cst_9 = arith.constant 0.000000e+00 : f32
    %36 = vector.broadcast %cst_9 : f32 to vector<8x1xf32>
    %37 = arith.maximumf %35, %36 : vector<8x1xf32>
    %38 = arith.mulf %37, %37 : vector<8x1xf32>
    %cst_10 = arith.constant -1.000000e+00 : f32
    %39 = vector.broadcast %cst_10 : f32 to vector<8x1xf32>
    %40 = arith.mulf %39, %38 : vector<8x1xf32>
    %41 = arith.mulf %40, %32 : vector<8x1xf32>
    %cst_11 = arith.constant 0.000000e+00 : f32
    %42 = vector.broadcast %cst_11 : f32 to vector<8x1xf32>
    %43 = arith.select %13, %41, %42 : vector<8x1xi1>, vector<8x1xf32>
    %44 = vector.shape_cast %43 : vector<8x1xf32> to vector<1x8x1xf32>
    %cst_12 = arith.constant dense<0.000000e+00> : vector<1xf32>
    %45 = vector.multi_reduction <add>, %44, %cst_12 [1, 2] : vector<1x8x1xf32> to vector<1xf32>
    %46 = vector.shape_cast %45 : vector<1xf32> to vector<1x1x1xf32>
    %47 = vector.extract %46[0, 0, 0] : f32 from vector<1x1x1xf32>
    %c0_13 = arith.constant 0 : index
    %c0_14 = arith.constant 0 : index
    %48 = memref.load %arg3[%c0_13, %c0_14] : memref<1x1xf32, #tpu.memory_space<smem>>
    memref.store %47, %arg3[%c0_13, %c0_14] : memref<1x1xf32, #tpu.memory_space<smem>>
    return
  }
  func.func @transform_0(%arg0: i32) -> (i32, i32) {
    %c0_i32 = arith.constant 0 : i32
    %c0_i32_0 = arith.constant 0 : i32
    return %arg0, %c0_i32 : i32, i32
  }
  func.func @transform_1(%arg0: i32) -> (i32, i32) {
    %c0_i32 = arith.constant 0 : i32
    %c0_i32_0 = arith.constant 0 : i32
    return %arg0, %c0_i32 : i32, i32
  }
  func.func @transform_2(%arg0: i32) -> (i32, i32) {
    %c0_i32 = arith.constant 0 : i32
    %c0_i32_0 = arith.constant 0 : i32
    return %arg0, %c0_i32 : i32, i32
  }
}

</mosaic_0001>

<bundles_post_ra>
// kernel: tpu_custom_call.1
= control target key start
LH: loop header
LB: loop body
LE: loop exit
PB: predicated region body
PF: predicated region fallthrough
CT: control target
= control target key end

     0   :  { %vm24_vm0 = vcmask 130048   ;;  %s139_s0 = inlined_call_operand.vmem [shape: f32[8,16], index: 0, kind: input, shape index: {}]   ;;  %s140_s1 = inlined_call_operand.vmem [shape: s32[8,1], index: 1, kind: input, shape index: {}]   ;;  %s141_s2 = inlined_call_operand.hbm [shape: f32[1,1], index: 2, kind: output, shape index: {}]  }
   0x1   :  { %v12_v0 = vld [vmem:[%s139_s0] sm:$0xff] }
   0x2   :  { %7 = vsyncpa [#allocation3], 0  ;;  %v25_v1 = vsel %vm24_vm0, %v12_v0, -inf  ;;  %v110_v2 = vmov 0   ;;  %v13_v3 = vld [vmem:[%s140_s1] sm:$0xff]  ;;  %v37_v9 = vlaneseq  ;;  %vm57_vm5 = vcmask 7168  }
   0x3   :  { %89 = vset.pattern.permute.xlu0 %v110_v2  ;;  %vm20_vm2 = vcmp.ge.s32.totalorder %v13_v3, 0  ;;  %vm22_vm3 = vcmp.lt.s32.totalorder %v13_v3, 16  ;;  %s75_s13 = sshll.u32 %s141_s2, 4  ;;  %s111_s15 = smov [#allocation2]   ;;  %s76_s13 = int_to_ptr.hbm [resolvable:$true] %s75_s13 }
   0x4   :  { %26 = vmax.xlane.f32.xlu0 %v25_v1  ;;  %v38_v10 = vand.u32 127, %v37_v9  ;;  %vm23_vm4 = vmand %vm20_vm2, %vm22_vm3 }
  0x18   :  { %40 = vperm.xlu0 %89, %v13_v3  }
  0x77   :  { %v27_v4 = vpop.xlane.xlu0 %26 }
  0x78   :  { %v28_v5 = vsub.f32 %v12_v0, %v27_v4 }
  0x7a   :  { %v29_v6 = vmul.f32 1.442695, %v28_v5 }
  0x7c   :  { %90 = vpow2.f32 %v29_v6 }
  0x82   :  { %v91_v7 = vpop.eup %90 }
  0x83   :  { %v31_v8 = vsel %vm24_vm0, %v91_v7, 0.0 }
  0x84   :  { %32 = vadd.xlane.f32.xlu1 %v31_v8 }
  0x8a   :  { %v41_v11 = vpop.permute.xlu0 %40 }
  0x8b   :  { %vm42_vm1 = vcmp.eq.s32.totalorder %v38_v10, %v41_v11 }
  0x8c   :  { %v43_v12 = vsel %vm42_vm1, %v12_v0, 0.0 }
  0x8d   :  { %v44_v13 = vsel %vm24_vm0, %v43_v12, 0.0 }
  0x8e   :  { %45 = vadd.xlane.f32.xlu1 %v44_v13 }
  0xf7   :  { %v33_v14 = vpop.xlane.xlu1 %32 }
  0xf8   :  { %92 = vlog2.f32 %v33_v14 }
  0xfe   :  { %v93_v15 = vpop.eup %92 }
  0xff   :  { %v35_v16 = vmul.f32 0.6931472, %v93_v15 }
 0x101   :  { %v36_v17 = vadd.f32 %v35_v16, %v27_v4  ;;  %v46_v18 = vpop.xlane.xlu1 %45 }
 0x103   :  { %v47_v19 = vsub.f32 %v46_v18, %v36_v17 }
 0x105   :  { %v48_v20 = vsel %vm23_vm4, %v47_v19, 0.0 }
 0x106   :  { %v49_v21 = vmul.f32 1.442695, %v48_v20 }
 0x108   :  { %94 = vpow2.f32 %v49_v21 }
 0x10e   :  { %v95_v22 = vpop.eup %94 }
 0x10f   :  { %v51_v23 = vsub.f32 1.0, %v95_v22 }
 0x111   :  { %v52_v24 = vmax.f32 %v51_v23, 0.0 }
 0x113   :  { %v53_v25 = vmul.f32 %v52_v24, %v52_v24 }
 0x115   :  { %v54_v26 = vmul.f32 -1.0, %v53_v25 }
 0x117   :  { %v55_v27 = vmul.f32 %v54_v26, %v48_v20 }
 0x119   :  { %v56_v28 = vsel %vm23_vm4, %v55_v27, 0.0 }
 0x11a   :  { %v58_v29 = vsel %vm57_vm5, %v56_v28, 0.0 }
 0x11b   :  { %59 = vadd.xlane.f32.xlu2 %v58_v29 }
 0x18e   :  { %v60_v30 = vpop.xlane.xlu2 %59 }
 0x18f   :  { %v61_v31 = vrot.slane %v60_v30, 4 }
 0x191   :  { %v62_v32 = vadd.f32 %v61_v31, %v60_v30 }
 0x193   :  { %v63_v33 = vrot.slane %v62_v32, 2 }
 0x195   :  { %v64_v34 = vadd.f32 %v63_v33, %v62_v32 }
 0x197   :  { %v65_v35 = vrot.slane %v64_v34, 1 }
 0x199   :  { %v66_v36 = vadd.f32 %v65_v35, %v64_v34 }
 0x19b   :  { %85 = vpush %v66_v36 }
 0x1cc   :  { %s86_s14 = spop %85 }
 0x1cd   :  { %69 = sst [smem:[#allocation2]] %s86_s14 }
 0x1ce   :  { %78 = dma.smem_to_hbm %s111_s15, 16, %s76_s13, [#allocation3]  }
 0x1cf   :  { %108 = dma.done.wait [#allocation3], 16  }
 0x1d0   :  { %109 = vsyncadd [#allocation3], 4294967280 }
 0x1d1   :  { %83 = sfence }
 0x1d2   :  { %84 = vsyncpa [#allocation3], 1 }

</bundles_post_ra>
